<compile_context>
chip_gen: v7x
topology: tpu7x:2x2x1
jax: 0.10.0
libtpu: 0.0.40
codegen_flags: <defaults>
</compile_context>

<pallas_src>
import functools
import numpy as np
import jax
import jax.numpy as jnp
from jax.experimental import pallas as pl
from jax.experimental.pallas import tpu as pltpu


# ---------------------------------------------------------------------------
# Generation-aware VMEM planning & tile-size helpers
# ---------------------------------------------------------------------------
def _vmem_plan():
    """VMEM limit and working budget for kernel 1, per TPU generation."""
    try:
        phys = int(pltpu.get_tpu_info().vmem_capacity_bytes)
    except Exception:
        phys = 64 << 20                       # conservative default (v7x-class)
    if phys <= (64 << 20):                    # v7x: 64 MiB physical, 2 TCs/chip
        return {"limit": 32 << 20, "budget": 12 << 20, "two_core": True}
    return {"limit": 72 << 20, "budget": 28 << 20, "two_core": False}   # v5e/v6e


def _pick_tk(n0, max_full=1024):
    """Contraction chunk over N0; must divide N0 exactly (or be the full extent)."""
    if n0 <= max_full:
        return n0
    for tk in (1024, 512, 256, 128):
        if n0 % tk == 0:
            return tk
    return n0       # no clean divisor: keep full extent (budget shrinks tm instead)


def _pick_row_tile_k1(n0, d, out_pad, tk, budget_bytes, two_core):
    """Row tile for kernel 1 so all live VMEM blocks fit the working budget."""
    n_x0_buf = 1 if tk == n0 else 2
    fixed = (n_x0_buf * tk * d * 2            # x0 (bf16), resident when K == 1
             + d * out_pad * 4                # Wt (f32), single-buffered resident
             + out_pad * 4)                   # b  (f32)
    per_row = (2 * tk * 1                     # adj (int8), double-buffered
               + 2 * d * 4                    # h   (f32) output tile
               + 2 * out_pad * 4)             # h_fc(f32) output tile
    tm = max(budget_bytes - fixed, 8 * per_row) // per_row
    tm = min(tm, 1024)
    if tm >= n0:
        if two_core and n0 >= 64:             # keep >=2 row tiles for 2-TC parts
            return min(((-(-n0 // 2) + 31) // 32) * 32, n0)
        return n0
    return min(max((tm // 32) * 32, 32), n0)


def _pick_row_tile(n, target=512):
    """Largest legal row tile <= target (multiple of 8, or full extent)."""
    if n <= target:
        return n
    return max((target // 8) * 8, 8)


def _spec(block_shape, index_map, n_buffers=None):
    """BlockSpec; optionally request an explicit buffer count (Buffered(1) for
    constant-index resident blocks). Falls back cleanly if unsupported."""
    if n_buffers is None:
        return pl.BlockSpec(block_shape, index_map)
    try:
        return pl.BlockSpec(block_shape, index_map,
                            pipeline_mode=pl.Buffered(n_buffers))
    except Exception:
        return pl.BlockSpec(block_shape, index_map)


# ---------------------------------------------------------------------------
# Kernel 1: metapath aggregation (stand-in for POHGNN_ctr_ntype_specific) with
# the fc head for type-0 rows fused into the finalize step.
#   grid = (row_tiles, P, K); rows 'parallel', the reductions P and K are last
#   and 'arbitrary'.  The f32 h output block is VMEM-resident across (P, K) and
#   is used directly as the accumulator; the fused fc output is 128-padded.
# ---------------------------------------------------------------------------
def _metapath_fc_kernel(adj_ref, x0_ref, wt_ref, b_ref, h_ref, hfc_ref, *, inv_p):
    p = pl.program_id(1)
    k = pl.program_id(2)

    @pl.when((p == 0) & (k == 0))
    def _():
        h_ref[...] = jnp.zeros_like(h_ref)

    # int8 0/1 adjacency -> bf16 (exact); bf16 x bf16 MXU with f32 accumulation
    # directly into the resident output block (no f32 upcast of the adj tile).
    h_ref[...] += jnp.dot(adj_ref[0].astype(jnp.bfloat16), x0_ref[...],
                          preferred_element_type=jnp.float32)

    @pl.when((p == pl.num_programs(1) - 1) & (k == pl.num_programs(2) - 1))
    def _():
        h0 = h_ref[...] * inv_p                       # mean over metapaths
        h_ref[...] = h0
        # fused fc head for the type-0 rows (lane-dense, 128-padded out dim):
        hfc_ref[...] = (jnp.dot(h0, wt_ref[...],
                                preferred_element_type=jnp.float32)
                        + b_ref[...]).astype(hfc_ref.dtype)


def metapath_fc_aggregate(adj, x0, wt_pad, b_pad):
    """h0 = mean_p(adj[p] @ x0);  hfc0 = h0 @ Wt + b  (fused)."""
    P, N0, _ = adj.shape
    D = x0.shape[1]
    out_pad = wt_pad.shape[1]

    plan = _vmem_plan()
    tk = _pick_tk(N0)
    if N0 % tk != 0:                 # safety: contraction tiles must divide exactly
        tk = N0
    n_k = N0 // tk
    tm = _pick_row_tile_k1(N0, D, out_pad, tk, plan["budget"], plan["two_core"])

    # int8 storage is exact for the 0/1 metapath adjacency this layer consumes
    # (2x fewer HBM bytes than bf16, 4x fewer than f32); the upcast to bf16 happens
    # in-kernel right before the MXU, so it also works on v7x (no integer MXU there).
    # TODO(synk): keep an f32 path if weighted / row-normalised adjacency is ever used.
    adj_i8 = adj.astype(jnp.int8)
    x0_bf = x0.astype(jnp.bfloat16)
    inv_p = float(1.0 / P)

    def build(single_buffer):
        x0_buf = 1 if (single_buffer and n_k == 1) else None
        res_buf = 1 if single_buffer else None
        kernel = functools.partial(_metapath_fc_kernel, inv_p=inv_p)
        return pl.pallas_call(
            kernel,
            out_shape=(jax.ShapeDtypeStruct((N0, D), jnp.float32),
                       jax.ShapeDtypeStruct((N0, out_pad), jnp.float32)),
            grid_spec=pltpu.PrefetchScalarGridSpec(
                num_scalar_prefetch=0,
                grid=(pl.cdiv(N0, tm), P, n_k),
                in_specs=[
                    _spec((1, tm, tk), lambda i, p, k: (p, i, k)),
                    _spec((tk, D), lambda i, p, k: (k, 0), x0_buf),
                    _spec((D, out_pad), lambda i, p, k: (0, 0), res_buf),
                    _spec((1, out_pad), lambda i, p, k: (0, 0), res_buf),
                ],
                out_specs=[
                    pl.BlockSpec((tm, D), lambda i, p, k: (i, 0)),
                    pl.BlockSpec((tm, out_pad), lambda i, p, k: (i, 0)),
                ]),
            compiler_params=pltpu.CompilerParams(
                dimension_semantics=("parallel", "arbitrary", "arbitrary"),
                vmem_limit_bytes=plan["limit"]),
        )(adj_i8, x0_bf, wt_pad, b_pad)

    try:
        out = build(single_buffer=True)
        jax.block_until_ready(out)
        return out
    except Exception:
        # pl.Buffered(1) unsupported on this jax/libtpu build -> default buffering.
        return build(single_buffer=False)


# ---------------------------------------------------------------------------
# Kernel 2: fc head for the pass-through (type-1 / type-2) rows.
# Weight is pre-transposed and 128-padded in the wrapper; rows tiled over a
# 'parallel' grid axis; Wt / b are VMEM-resident (single-buffered); the output
# last dim is a multiple of 128 so stores are lane-dense / unmasked.
# ---------------------------------------------------------------------------
def _fc_kernel(h_ref, wt_ref, b_ref, out_ref):
    out_ref[...] = (jnp.dot(h_ref[...], wt_ref[...],
                            preferred_element_type=jnp.float32)
                    + b_ref[...]).astype(out_ref.dtype)


def fc_linear_padded(h, wt_pad, b_pad, *, row_tile=512):
    N, in_dim = h.shape
    out_pad = wt_pad.shape[1]
    tm = _pick_row_tile(N, row_tile)

    def build(single_buffer):
        res_buf = 1 if single_buffer else None
        return pl.pallas_call(
            _fc_kernel,
            out_shape=jax.ShapeDtypeStruct((N, out_pad), h.dtype),
            grid_spec=pltpu.PrefetchScalarGridSpec(
                num_scalar_prefetch=0,
                grid=(pl.cdiv(N, tm),),
                in_specs=[pl.BlockSpec((tm, in_dim), lambda i: (i, 0)),
                          _spec((in_dim, out_pad), lambda i: (0, 0), res_buf),
                          _spec((1, out_pad), lambda i: (0, 0), res_buf)],
                out_specs=pl.BlockSpec((tm, out_pad), lambda i: (i, 0))),
            compiler_params=pltpu.CompilerParams(
                dimension_semantics=("parallel",),
                vmem_limit_bytes=32 << 20),
        )(h, wt_pad, b_pad)

    try:
        out = build(single_buffer=True)
        jax.block_until_ready(out)
        return out
    except Exception:
        return build(single_buffer=False)


# ---------------------------------------------------------------------------
# SHGNN_nc_layer.forward  (fc_switch = False branch)
# ---------------------------------------------------------------------------
def shgnn_nc_layer_forward(params, features, type_mask, adj_matrixes,
                           feature_idxes):
    in_dim = params["w"].shape[1]
    out_dim = params["w"].shape[0]
    N = type_mask.shape[0]

    idx0 = np.where(type_mask == 0)[0]
    idx1 = np.where(type_mask == 1)[0]
    idx2 = np.where(type_mask == 2)[0]

    # fc params: transposed once and 128-padded on the out dim (lane-dense MXU /
    # store path); the pad is sliced off exactly once at the very end.
    out_pad = ((out_dim + 127) // 128) * 128
    wt_pad = jnp.transpose(params["w"])                   # [in_dim, out_dim]
    b_pad = params["b"]
    if out_pad != out_dim:
        wt_pad = jnp.pad(wt_pad, ((0, 0), (0, out_pad - out_dim)))
        b_pad = jnp.pad(b_pad, ((0, 0), (0, out_pad - out_dim)))

    # TODO(synk): POHGNN_ctr_ntype_specific source was not provided; stand-in =
    # mean-over-metapaths neighbour aggregation for type-0 nodes and identity
    # pass-through features for type-1 / type-2 nodes.
    x0 = features[feature_idxes[0]]                       # [N0, in_dim]
    h_temp, hfc0_pad = metapath_fc_aggregate(adj_matrixes, x0, wt_pad, b_pad)

    temp1 = features[idx1]
    temp2 = features[idx2]
    h12 = jnp.concatenate([temp1, temp2], axis=0)
    if h12.shape[0] > 0:
        hfc12_pad = fc_linear_padded(h12, wt_pad, b_pad)
    else:
        hfc12_pad = jnp.zeros((0, out_pad), features.dtype)

    # Assemble h / h_fc.  When node types are contiguous sorted blocks (the
    # common case and the test layout) a concatenation avoids the zeros-init +
    # three scatters of full (N, dim) buffers in HBM.
    idx_all = np.concatenate([idx0, idx1, idx2])
    if idx_all.size == N and np.array_equal(idx_all, np.arange(N)):
        h = jnp.concatenate([h_temp, temp1, temp2], axis=0)
        h_fc = jnp.concatenate([hfc0_pad, hfc12_pad], axis=0)[:, :out_dim]
    else:
        h = jnp.zeros((N, in_dim), features.dtype)
        h = h.at[idx0].set(h_temp).at[idx1].set(temp1).at[idx2].set(temp2)
        n1 = idx1.shape[0]
        h_fc = jnp.zeros((N, out_dim), features.dtype)
        h_fc = (h_fc.at[idx0].set(hfc0_pad[:, :out_dim])
                      .at[idx1].set(hfc12_pad[:n1, :out_dim])
                      .at[idx2].set(hfc12_pad[n1:, :out_dim]))
    return h_fc, h


def init_params(key, in_dim, out_dim):
    kw, kb = jax.random.split(key)
    gain = 1.414
    std = gain * float(np.sqrt(2.0 / (in_dim + out_dim)))  # xavier_normal_
    w = std * jax.random.normal(kw, (out_dim, in_dim), jnp.float32)
    bound = 1.0 / float(np.sqrt(in_dim))
    b = jax.random.uniform(kb, (1, out_dim), jnp.float32, -bound, bound)
    return {"w": w, "b": b}


if __name__ == "__main__":
    key = jax.random.PRNGKey(0)
    k_feat, k_adj, k_par = jax.random.split(key, 3)

    N = 24           # total nodes (8 of each of types 0, 1, 2)
    in_dim = 32
    out_dim = 16
    num_metapaths = 3
    N0 = 8

    type_mask = np.array([0] * N0 + [1] * N0 + [2] * N0, dtype=np.int32)
    features = jax.random.normal(k_feat, (N, in_dim), jnp.float32)
    adj_matrixes = (jax.random.uniform(k_adj, (num_metapaths, N0, N0))
                    > 0.5).astype(jnp.float32)
    feature_idxes = [np.where(type_mask == 0)[0]]

    params = init_params(k_par, in_dim, out_dim)

    h_fc, h = shgnn_nc_layer_forward(params, features, type_mask,
                                     adj_matrixes, feature_idxes)
    jax.block_until_ready((h_fc, h))

    # Pure-JAX reference; x0 is quantised to bf16 to model the kernel's MXU feed
    # (the 0/1 adjacency is exact in int8/bf16, accumulation stays f32).
    idx1 = np.where(type_mask == 1)[0]
    idx2 = np.where(type_mask == 2)[0]
    x0 = features[feature_idxes[0]]
    x0_q = x0.astype(jnp.bfloat16).astype(jnp.float32)
    ref_h0 = jnp.mean(jnp.einsum('pij,jd->pid', adj_matrixes, x0_q), axis=0)
    ref_h = jnp.concatenate([ref_h0, features[idx1], features[idx2]], axis=0)
    ref_fc = ref_h @ params["w"].T + params["b"]

    assert h_fc.shape == (N, out_dim) and h.shape == (N, in_dim)
    np.testing.assert_allclose(np.asarray(h), np.asarray(ref_h),
                               rtol=5e-3, atol=5e-3)
    np.testing.assert_allclose(np.asarray(h_fc), np.asarray(ref_fc),
                               rtol=5e-3, atol=5e-3)
    print("KERNEL_OK")
</pallas_src>

<mosaic_0001>
module attributes {stable_mosaic.version = 11 : i64} {
  func.func @_metapath_fc_kernel(%arg0: i32, %arg1: i32, %arg2: i32, %arg3: memref<1x8x8xi8, #tpu.memory_space<vmem>>, %arg4: memref<8x32xbf16, #tpu.memory_space<vmem>>, %arg5: memref<32x128xf32, #tpu.memory_space<vmem>>, %arg6: memref<1x128xf32, #tpu.memory_space<vmem>>, %arg7: memref<8x32xf32, #tpu.memory_space<vmem>>, %arg8: memref<8x128xf32, #tpu.memory_space<vmem>>) attributes {dimension_semantics = [#tpu.dimension_semantics<parallel>, #tpu.dimension_semantics<arbitrary>, #tpu.dimension_semantics<arbitrary>], iteration_bounds = array<i64: 1, 3, 1>, scalar_prefetch = 0 : i64, scratch_operands = 0 : i64, tpu.core_type = #tpu.core_type<tc>, window_params = [{transform_indices = @transform_0, window_bounds = array<i64: 1, 8, 8>}, {pipeline_mode = #tpu.pipeline_mode<synchronous>, transform_indices = @transform_1, window_bounds = array<i64: 8, 32>}, {pipeline_mode = #tpu.pipeline_mode<synchronous>, transform_indices = @transform_2, window_bounds = array<i64: 32, 128>}, {pipeline_mode = #tpu.pipeline_mode<synchronous>, transform_indices = @transform_3, window_bounds = array<i64: 1, 128>}, {transform_indices = @transform_4, window_bounds = array<i64: 8, 32>}, {transform_indices = @transform_5, window_bounds = array<i64: 8, 128>}]} {
    %c0_i32 = arith.constant 0 : i32
    %0 = arith.cmpi eq, %arg1, %c0_i32 : i32
    %c0_i32_0 = arith.constant 0 : i32
    %1 = arith.cmpi eq, %arg2, %c0_i32_0 : i32
    %2 = arith.andi %0, %1 : i1
    %3 = arith.extui %2 : i1 to i32
    %c0_i32_1 = arith.constant 0 : i32
    %4 = arith.cmpi ne, %3, %c0_i32_1 : i32
    scf.if %4 {
      %cst_12 = arith.constant 0.000000e+00 : f32
      %18 = vector.broadcast %cst_12 : f32 to vector<8x32xf32>
      %c0_13 = arith.constant 0 : index
      %c0_14 = arith.constant 0 : index
      %19 = vector.load %arg7[%c0_13, %c0_14] : memref<8x32xf32, #tpu.memory_space<vmem>>, vector<8x32xf32>
      tpu.vector_store %arg7[%c0_13, %c0_14], %18 {strides = array<i32>} : memref<8x32xf32, #tpu.memory_space<vmem>>, vector<8x32xf32>,
    } else {
    }
    %c0 = arith.constant 0 : index
    %c0_2 = arith.constant 0 : index
    %5 = vector.load %arg7[%c0, %c0_2] : memref<8x32xf32, #tpu.memory_space<vmem>>, vector<8x32xf32>
    %c0_3 = arith.constant 0 : index
    %c0_4 = arith.constant 0 : index
    %c0_5 = arith.constant 0 : index
    %6 = vector.load %arg3[%c0_3, %c0_4, %c0_5] : memref<1x8x8xi8, #tpu.memory_space<vmem>>, vector<1x8x8xi8>
    %7 = vector.shape_cast %6 : vector<1x8x8xi8> to vector<8x8xi8>
    %8 = arith.sitofp %7 : vector<8x8xi8> to vector<8x8xbf16>
    %c0_6 = arith.constant 0 : index
    %c0_7 = arith.constant 0 : index
    %9 = vector.load %arg4[%c0_6, %c0_7] : memref<8x32xbf16, #tpu.memory_space<vmem>>, vector<8x32xbf16>
    %cst = arith.constant dense<0.000000e+00> : vector<8x32xf32>
    %10 = tpu.matmul %8, %9, %cst {dimension_numbers = #tpu.dot_dimension_numbers<[1], [0], [0], [1], [0, 0, 1, 1], [], []>} : vector<8x8xbf16>, vector<8x32xbf16>, vector<8x32xf32> -> vector<8x32xf32>
    %11 = arith.addf %5, %10 : vector<8x32xf32>
    %c0_8 = arith.constant 0 : index
    %c0_9 = arith.constant 0 : index
    %12 = vector.load %arg7[%c0_8, %c0_9] : memref<8x32xf32, #tpu.memory_space<vmem>>, vector<8x32xf32>
    tpu.vector_store %arg7[%c0_8, %c0_9], %11 {strides = array<i32>} : memref<8x32xf32, #tpu.memory_space<vmem>>, vector<8x32xf32>,
    %c2_i32 = arith.constant 2 : i32
    %13 = arith.cmpi eq, %arg1, %c2_i32 : i32
    %c0_i32_10 = arith.constant 0 : i32
    %14 = arith.cmpi eq, %arg2, %c0_i32_10 : i32
    %15 = arith.andi %13, %14 : i1
    %16 = arith.extui %15 : i1 to i32
    %c0_i32_11 = arith.constant 0 : i32
    %17 = arith.cmpi ne, %16, %c0_i32_11 : i32
    scf.if %17 {
      %c0_12 = arith.constant 0 : index
      %c0_13 = arith.constant 0 : index
      %18 = vector.load %arg7[%c0_12, %c0_13] : memref<8x32xf32, #tpu.memory_space<vmem>>, vector<8x32xf32>
      %cst_14 = arith.constant 0.333333343 : f32
      %19 = vector.broadcast %cst_14 : f32 to vector<8x32xf32>
      %20 = arith.mulf %18, %19 : vector<8x32xf32>
      %c0_15 = arith.constant 0 : index
      %c0_16 = arith.constant 0 : index
      %21 = vector.load %arg7[%c0_15, %c0_16] : memref<8x32xf32, #tpu.memory_space<vmem>>, vector<8x32xf32>
      tpu.vector_store %arg7[%c0_15, %c0_16], %20 {strides = array<i32>} : memref<8x32xf32, #tpu.memory_space<vmem>>, vector<8x32xf32>,
      %c0_17 = arith.constant 0 : index
      %c0_18 = arith.constant 0 : index
      %22 = vector.load %arg5[%c0_17, %c0_18] : memref<32x128xf32, #tpu.memory_space<vmem>>, vector<32x128xf32>
      %cst_19 = arith.constant dense<0.000000e+00> : vector<8x128xf32>
      %23 = tpu.matmul %20, %22, %cst_19 {dimension_numbers = #tpu.dot_dimension_numbers<[1], [0], [0], [1], [0, 0, 1, 1], [], []>} : vector<8x32xf32>, vector<32x128xf32>, vector<8x128xf32> -> vector<8x128xf32>
      %c0_20 = arith.constant 0 : index
      %c0_21 = arith.constant 0 : index
      %24 = vector.load %arg6[%c0_20, %c0_21] : memref<1x128xf32, #tpu.memory_space<vmem>>, vector<1x128xf32>
      %25 = vector.broadcast %24 : vector<1x128xf32> to vector<8x128xf32>
      %26 = arith.addf %23, %25 : vector<8x128xf32>
      %c0_22 = arith.constant 0 : index
      %c0_23 = arith.constant 0 : index
      %27 = vector.load %arg8[%c0_22, %c0_23] : memref<8x128xf32, #tpu.memory_space<vmem>>, vector<8x128xf32>
      tpu.vector_store %arg8[%c0_22, %c0_23], %26 {strides = array<i32>} : memref<8x128xf32, #tpu.memory_space<vmem>>, vector<8x128xf32>,
    } else {
    }
    return
  }
  func.func @transform_0(%arg0: i32, %arg1: i32, %arg2: i32) -> (i32, i32, i32) {
    %c0_i32 = arith.constant 0 : i32
    return %arg1, %arg0, %arg2 : i32, i32, i32
  }
  func.func @transform_1(%arg0: i32, %arg1: i32, %arg2: i32) -> (i32, i32) {
    %c0_i32 = arith.constant 0 : i32
    %c0_i32_0 = arith.constant 0 : i32
    return %arg2, %c0_i32 : i32, i32
  }
  func.func @transform_2(%arg0: i32, %arg1: i32, %arg2: i32) -> (i32, i32) {
    %c0_i32 = arith.constant 0 : i32
    %c0_i32_0 = arith.constant 0 : i32
    %c0_i32_1 = arith.constant 0 : i32
    return %c0_i32, %c0_i32_0 : i32, i32
  }
  func.func @transform_3(%arg0: i32, %arg1: i32, %arg2: i32) -> (i32, i32) {
    %c0_i32 = arith.constant 0 : i32
    %c0_i32_0 = arith.constant 0 : i32
    %c0_i32_1 = arith.constant 0 : i32
    return %c0_i32, %c0_i32_0 : i32, i32
  }
  func.func @transform_4(%arg0: i32, %arg1: i32, %arg2: i32) -> (i32, i32) {
    %c0_i32 = arith.constant 0 : i32
    %c0_i32_0 = arith.constant 0 : i32
    return %arg0, %c0_i32 : i32, i32
  }
  func.func @transform_5(%arg0: i32, %arg1: i32, %arg2: i32) -> (i32, i32) {
    %c0_i32 = arith.constant 0 : i32
    %c0_i32_0 = arith.constant 0 : i32
    return %arg0, %c0_i32 : i32, i32
  }
}

module attributes {stable_mosaic.version = 11 : i64} {
  func.func @_metapath_fc_kernel(%arg0: i32, %arg1: i32, %arg2: i32, %arg3: memref<1x8x8xi8, #tpu.memory_space<vmem>>, %arg4: memref<8x32xbf16, #tpu.memory_space<vmem>>, %arg5: memref<32x128xf32, #tpu.memory_space<vmem>>, %arg6: memref<1x128xf32, #tpu.memory_space<vmem>>, %arg7: memref<8x32xf32, #tpu.memory_space<vmem>>, %arg8: memref<8x128xf32, #tpu.memory_space<vmem>>) attributes {dimension_semantics = [#tpu.dimension_semantics<parallel>, #tpu.dimension_semantics<arbitrary>, #tpu.dimension_semantics<arbitrary>], iteration_bounds = array<i64: 1, 3, 1>, scalar_prefetch = 0 : i64, scratch_operands = 0 : i64, tpu.core_type = #tpu.core_type<tc>, window_params = [{transform_indices = @transform_0, window_bounds = array<i64: 1, 8, 8>}, {transform_indices = @transform_1, window_bounds = array<i64: 8, 32>}, {pipeline_mode = #tpu.pipeline_mode<synchronous>, transform_indices = @transform_2, window_bounds = array<i64: 32, 128>}, {pipeline_mode = #tpu.pipeline_mode<synchronous>, transform_indices = @transform_3, window_bounds = array<i64: 1, 128>}, {transform_indices = @transform_4, window_bounds = array<i64: 8, 32>}, {transform_indices = @transform_5, window_bounds = array<i64: 8, 128>}]} {
    %c0_i32 = arith.constant 0 : i32
    %0 = arith.cmpi eq, %arg1, %c0_i32 : i32
    %c0_i32_0 = arith.constant 0 : i32
    %1 = arith.cmpi eq, %arg2, %c0_i32_0 : i32
    %2 = arith.andi %0, %1 : i1
    %3 = arith.extui %2 : i1 to i32
    %c0_i32_1 = arith.constant 0 : i32
    %4 = arith.cmpi ne, %3, %c0_i32_1 : i32
    scf.if %4 {
      %cst_12 = arith.constant 0.000000e+00 : f32
      %18 = vector.broadcast %cst_12 : f32 to vector<8x32xf32>
      %c0_13 = arith.constant 0 : index
      %c0_14 = arith.constant 0 : index
      %19 = vector.load %arg7[%c0_13, %c0_14] : memref<8x32xf32, #tpu.memory_space<vmem>>, vector<8x32xf32>
      tpu.vector_store %arg7[%c0_13, %c0_14], %18 {strides = array<i32>} : memref<8x32xf32, #tpu.memory_space<vmem>>, vector<8x32xf32>,
    } else {
    }
    %c0 = arith.constant 0 : index
    %c0_2 = arith.constant 0 : index
    %5 = vector.load %arg7[%c0, %c0_2] : memref<8x32xf32, #tpu.memory_space<vmem>>, vector<8x32xf32>
    %c0_3 = arith.constant 0 : index
    %c0_4 = arith.constant 0 : index
    %c0_5 = arith.constant 0 : index
    %6 = vector.load %arg3[%c0_3, %c0_4, %c0_5] : memref<1x8x8xi8, #tpu.memory_space<vmem>>, vector<1x8x8xi8>
    %7 = vector.shape_cast %6 : vector<1x8x8xi8> to vector<8x8xi8>
    %8 = arith.sitofp %7 : vector<8x8xi8> to vector<8x8xbf16>
    %c0_6 = arith.constant 0 : index
    %c0_7 = arith.constant 0 : index
    %9 = vector.load %arg4[%c0_6, %c0_7] : memref<8x32xbf16, #tpu.memory_space<vmem>>, vector<8x32xbf16>
    %cst = arith.constant dense<0.000000e+00> : vector<8x32xf32>
    %10 = tpu.matmul %8, %9, %cst {dimension_numbers = #tpu.dot_dimension_numbers<[1], [0], [0], [1], [0, 0, 1, 1], [], []>} : vector<8x8xbf16>, vector<8x32xbf16>, vector<8x32xf32> -> vector<8x32xf32>
    %11 = arith.addf %5, %10 : vector<8x32xf32>
    %c0_8 = arith.constant 0 : index
    %c0_9 = arith.constant 0 : index
    %12 = vector.load %arg7[%c0_8, %c0_9] : memref<8x32xf32, #tpu.memory_space<vmem>>, vector<8x32xf32>
    tpu.vector_store %arg7[%c0_8, %c0_9], %11 {strides = array<i32>} : memref<8x32xf32, #tpu.memory_space<vmem>>, vector<8x32xf32>,
    %c2_i32 = arith.constant 2 : i32
    %13 = arith.cmpi eq, %arg1, %c2_i32 : i32
    %c0_i32_10 = arith.constant 0 : i32
    %14 = arith.cmpi eq, %arg2, %c0_i32_10 : i32
    %15 = arith.andi %13, %14 : i1
    %16 = arith.extui %15 : i1 to i32
    %c0_i32_11 = arith.constant 0 : i32
    %17 = arith.cmpi ne, %16, %c0_i32_11 : i32
    scf.if %17 {
      %c0_12 = arith.constant 0 : index
      %c0_13 = arith.constant 0 : index
      %18 = vector.load %arg7[%c0_12, %c0_13] : memref<8x32xf32, #tpu.memory_space<vmem>>, vector<8x32xf32>
      %cst_14 = arith.constant 0.333333343 : f32
      %19 = vector.broadcast %cst_14 : f32 to vector<8x32xf32>
      %20 = arith.mulf %18, %19 : vector<8x32xf32>
      %c0_15 = arith.constant 0 : index
      %c0_16 = arith.constant 0 : index
      %21 = vector.load %arg7[%c0_15, %c0_16] : memref<8x32xf32, #tpu.memory_space<vmem>>, vector<8x32xf32>
      tpu.vector_store %arg7[%c0_15, %c0_16], %20 {strides = array<i32>} : memref<8x32xf32, #tpu.memory_space<vmem>>, vector<8x32xf32>,
      %c0_17 = arith.constant 0 : index
      %c0_18 = arith.constant 0 : index
      %22 = vector.load %arg5[%c0_17, %c0_18] : memref<32x128xf32, #tpu.memory_space<vmem>>, vector<32x128xf32>
      %cst_19 = arith.constant dense<0.000000e+00> : vector<8x128xf32>
      %23 = tpu.matmul %20, %22, %cst_19 {dimension_numbers = #tpu.dot_dimension_numbers<[1], [0], [0], [1], [0, 0, 1, 1], [], []>} : vector<8x32xf32>, vector<32x128xf32>, vector<8x128xf32> -> vector<8x128xf32>
      %c0_20 = arith.constant 0 : index
      %c0_21 = arith.constant 0 : index
      %24 = vector.load %arg6[%c0_20, %c0_21] : memref<1x128xf32, #tpu.memory_space<vmem>>, vector<1x128xf32>
      %25 = vector.broadcast %24 : vector<1x128xf32> to vector<8x128xf32>
      %26 = arith.addf %23, %25 : vector<8x128xf32>
      %c0_22 = arith.constant 0 : index
      %c0_23 = arith.constant 0 : index
      %27 = vector.load %arg8[%c0_22, %c0_23] : memref<8x128xf32, #tpu.memory_space<vmem>>, vector<8x128xf32>
      tpu.vector_store %arg8[%c0_22, %c0_23], %26 {strides = array<i32>} : memref<8x128xf32, #tpu.memory_space<vmem>>, vector<8x128xf32>,
    } else {
    }
    return
  }
  func.func @transform_0(%arg0: i32, %arg1: i32, %arg2: i32) -> (i32, i32, i32) {
    %c0_i32 = arith.constant 0 : i32
    return %arg1, %arg0, %arg2 : i32, i32, i32
  }
  func.func @transform_1(%arg0: i32, %arg1: i32, %arg2: i32) -> (i32, i32) {
    %c0_i32 = arith.constant 0 : i32
    %c0_i32_0 = arith.constant 0 : i32
    return %arg2, %c0_i32 : i32, i32
  }
  func.func @transform_2(%arg0: i32, %arg1: i32, %arg2: i32) -> (i32, i32) {
    %c0_i32 = arith.constant 0 : i32
    %c0_i32_0 = arith.constant 0 : i32
    %c0_i32_1 = arith.constant 0 : i32
    return %c0_i32, %c0_i32_0 : i32, i32
  }
  func.func @transform_3(%arg0: i32, %arg1: i32, %arg2: i32) -> (i32, i32) {
    %c0_i32 = arith.constant 0 : i32
    %c0_i32_0 = arith.constant 0 : i32
    %c0_i32_1 = arith.constant 0 : i32
    return %c0_i32, %c0_i32_0 : i32, i32
  }
  func.func @transform_4(%arg0: i32, %arg1: i32, %arg2: i32) -> (i32, i32) {
    %c0_i32 = arith.constant 0 : i32
    %c0_i32_0 = arith.constant 0 : i32
    return %arg0, %c0_i32 : i32, i32
  }
  func.func @transform_5(%arg0: i32, %arg1: i32, %arg2: i32) -> (i32, i32) {
    %c0_i32 = arith.constant 0 : i32
    %c0_i32_0 = arith.constant 0 : i32
    return %arg0, %c0_i32 : i32, i32
  }
}

</mosaic_0001>

<bundles_post_ra>
// kernel: tpu_custom_call.1
= control target key start
LH: loop header
LB: loop body
LE: loop exit
PB: predicated region body
PF: predicated region fallthrough
CT: control target
= control target key end

     0   :  { %11 = vsyncpa [#allocation3], 0  ;;  %s1224_s0 = inlined_call_operand.hbm [shape: s8[3,8,8], index: 0, kind: input, shape index: {}]   ;;  %s1225_s1 = inlined_call_operand.hbm [shape: bf16[8,32], index: 1, kind: input, shape index: {}]   ;;  %s1226_s2 = inlined_call_operand.hbm [shape: f32[32,128], index: 2, kind: input, shape index: {}]   ;;  %s1227_s3 = inlined_call_operand.vmem [shape: f32[1,128], index: 3, kind: input, shape index: {}]   ;;  %s1228_s4 = inlined_call_operand.hbm [shape: f32[8,32], index: 4, kind: output, shape index: {0}]   ;;  %s1229_s5 = inlined_call_operand.hbm [shape: f32[8,128], index: 5, kind: output, shape index: {1}]  }
   0x1   :  { %13 = vsyncpa [#allocation3 + $0x1], 0 }
   0x2   :  { %14 = vsyncpa [#allocation6], 0 }
   0x3   :  { %15 = vsyncpa [#allocation4], 0 }
   0x4   :  { %16 = vsyncpa [#allocation10], 0  ;;  %s972_s18 = smov 0   ;;  %s974_s19 = smov 0  }
   0x5   :  { %s976_s20 = smov 0   ;;  %s978_s21 = smov 0  }
   0x6   :  { %s980_s22 = smov 0   ;;  %s982_s23 = smov 0  }
   0x7 LB: > { %s575_s24 = sadd.s32 4294967295, %s927_s23   ;;  %p65_p0 = scmp.ne.s32.totalorder %s911_s19, %s907_s18  ;;  %s927_s23 = sphi %s982_s23, %s22_s23   ;;  %s923_s22 = sphi %s980_s22, %s1247_s22   ;;  %s919_s21 = sphi %s978_s21, %s1246_s21   ;;  %s915_s20 = sphi %s976_s20, %s1245_s20   ;;  %s911_s19 = sphi %s974_s19, %s1244_s19   ;;  %s907_s18 = sphi %s972_s18, %s1243_s18  }
   0x8   : > { %p1004_p1 = scmp.eq.s32.totalorder %s575_s24, 0  ;;  %p576_p2 = scmp.ge.s32.totalorder %s927_s23, 1 }
   0x9   : > { %p196_p3 = scmp.lt.s32.totalorder %s927_s23, 4  ;;  %s929_s28 = smov [#allocation5]  }
   0xa   : > { %s1234_s25 = scalar_select %p1004_p1, 1, 0 }
   0xb   : > { %p1012_p4 = por %p1004_p1, %p65_p0  ;;  %p1016_p5 = pnand %p576_p2, %p196_p3 }
   0xc   : > { %s211_s29 = sshll.u32 %s929_s28, 4  ;;  %s930_s30 = smov [#allocation7]   ;;  %s212_s29 = int_to_ptr.vmem [resolvable:$true] %s211_s29 }
   0xd   : > { %s1235_s26 = scalar_select %p1012_p4, 1, 0 }
   0xe   : > { %s1236_s27 = scalar_select %p1016_p5, 1, 0 }
   0xf   : > { %p647_p6 = pneg %p1016_p5  ;;  %s221_s6 = sshll.u32 %s930_s30, 4  ;;  %s1028_s6 = int_to_ptr.vmem [resolvable:$true] %s221_s6 }
  0x10   : > { %s727_s10 = scalar_lea.hbm %s1225_s1, 64 }
  0x11   : > { %p1024_p7 = pnand %p647_p6, %p1004_p1  ;;  %p728_p8 = scmp.ne.s32.totalorder %s1225_s1, %s727_s10 }
  0x12   : > { %p734_p12 = scmp.lt.u32.totalorder %s727_s10, %s1225_s1 }
  0x13   : > { %p729_p9 = pneg %p1024_p7 }
  0x15   : > { %p730_p10 = pnand %p729_p9, %p728_p8 }
  0x17   : > { %p731_p11 = pneg %p730_p10 }
  0x19   : > { %p736_p13 = pnand %p734_p12, %p731_p11 }
  0x1b   : > { %739 = shalt.err (!%p736_p13)
}
  0x1c   : > { %s740_s15 = scalar_lea.vmem %s212_s29, 64  ;;  %p748_p6 = scmp.lt.s32.totalorder %s212_s29, %s212_s29 }
  0x1d   : > { %p741_p0 = scmp.ne.s32.totalorder %s212_s29, %s740_s15  ;;  %p749_p1 = scmp.lt.s32.totalorder %s740_s15, %s740_s15 }
  0x1f   : > { %p743_p2 = pnand %p741_p0, %p729_p9  ;;  %p750_p4 = por %p749_p1, %p748_p6 }
  0x21   : > { %p744_p3 = pneg %p743_p2 }
  0x23   : > { %p751_p5 = pnand %p750_p4, %p744_p3 }
  0x25   : > { %754 = shalt.err (!%p751_p5)
}
  0x26   : > { %650 = dma.hbm_to_vmem [thread:$0]  (!%p1024_p7), %s1225_s1, 64, %s212_s29, [#allocation6]  }
  0x27   : > { %s755_s30 = scalar_lea.hbm %s1226_s2, 512 }
  0x28   : > { %p756_p8 = scmp.ne.s32.totalorder %s1226_s2, %s755_s30  ;;  %p762_p5 = scmp.lt.u32.totalorder %s755_s30, %s1226_s2 }
  0x2a   : > { %p758_p1 = pnand %p756_p8, %p729_p9 }
  0x2c   : > { %p759_p4 = pneg %p758_p1 }
  0x2e   : > { %p764_p10 = pnand %p762_p5, %p759_p4 }
  0x30   : > { %767 = shalt.err (!%p764_p10)
}
  0x31   : > { %s768_s29 = scalar_lea.vmem %s1028_s6, 512  ;;  %p776_p0 = scmp.lt.s32.totalorder %s1028_s6, %s1028_s6 }
  0x32   : > { %p769_p11 = scmp.ne.s32.totalorder %s1028_s6, %s768_s29  ;;  %p777_p2 = scmp.lt.s32.totalorder %s768_s29, %s768_s29 }
  0x34   : > { %p771_p12 = pnand %p769_p11, %p729_p9  ;;  %p778_p3 = por %p777_p2, %p776_p0 }
  0x36   : > { %p772_p13 = pneg %p771_p12 }
  0x38   : > { %p779_p6 = pnand %p778_p3, %p772_p13 }
  0x3a   : > { %782 = shalt.err (!%p779_p6)
}
  0x3b   : > { %s931_s12 = smov 128   ;;  %s932_s13 = smov 8  }
  0x3c   : > { %653 = dma.hbm_to_vmem [thread:$0]  (!%p1024_p7), %s1226_s2, 512, %s1028_s6, [#allocation6], %s931_s12, %s931_s12, %s932_s13  }
  0x3d   : > { %s37_s16 = sadd.s32 1, %s923_s22  ;;  %s52_s17 = sadd.s32 1, %s915_s20 }
  0x3e   : > { %p39_p9 = scmp.ge.s32.totalorder %s37_s16, 3  ;;  %p59_p8 = scmp.ne.s32.totalorder %s915_s20, %s911_s19 }
  0x3f   : > { %p60_p1 = scmp.eq.s32.totalorder %s927_s23, 0  ;;  %p660_p4 = scmp.lt.s32.totalorder %s927_s23, 3 }
  0x40   : > { %s1249_s16 = smov (%p39_p9, %s37_s16), 0  ;;  %s238_s18 = sand.u32 1, %s915_s20  }
  0x41   : > { %p61_p5 = por %p60_p1, %p59_p8  ;;  %s45_s28 = ssub.s32 %s923_s22, %s1249_s16 }
  0x42   : > { %p50_p10 = scmp.eq.s32.totalorder %s45_s28, 0  ;;  %s580_s30 = sshll.u32 %s238_s18, 1 }
  0x43   : > { %s581_s7 = sshll.u32 %s923_s22, 5  ;;  %s242_s11 = scalar_lea.vmem [#allocation2], %s580_s30 }
  0x44   : > { %s1090_s8 = scalar_select %p50_p10, %s915_s20, %s52_s17  }
  0x45   : > { %s1095_s10 = scalar_lea.hbm %s1224_s0, %s581_s7  ;;  %s251_s29 = sshll.u32 %s242_s11, 4  ;;  %s1097_s29 = int_to_ptr.vmem [resolvable:$true] %s251_s29 }
  0x46   : > { %p1101_p7 = pnand %p660_p4, %p61_p5  ;;  %s239_s13 = scalar_lea.sflag [#allocation3], %s238_s18 }
  0x47   : > { %s783_s14 = scalar_lea.hbm %s1095_s10, 32  ;;  %s788_s28 = scalar_lea.hbm %s1224_s0, 96 }
  0x48   : > { %p784_p11 = scmp.ne.s32.totalorder %s1095_s10, %s783_s14  ;;  %p785_p12 = pneg %p1101_p7 }
  0x49   : > { %p789_p2 = scmp.lt.u32.totalorder %s1095_s10, %s1224_s0  ;;  %p790_p3 = scmp.lt.u32.totalorder %s788_s28, %s783_s14 }
  0x4a   : > { %p786_p13 = pnand %p785_p12, %p784_p11  ;;  %p792_p9 = scmp.lt.u32.totalorder %s783_s14, %s1095_s10 }
  0x4b   : > { %p791_p6 = por %p790_p3, %p789_p2 }
  0x4c   : > { %p787_p0 = pneg %p786_p13 }
  0x4d   : > { %p793_p8 = por %p792_p9, %p791_p6 }
  0x4f   : > { %p794_p1 = pnand %p793_p8, %p787_p0 }
  0x51   : > { %797 = shalt.err (!%p794_p1)
}
  0x52   : > { %s798_s18 = scalar_lea.vmem %s1097_s29, 32  ;;  %s933_s9 = smov [#allocation2]  }
  0x53   : > { %p799_p4 = scmp.ne.s32.totalorder %s1097_s29, %s798_s18  ;;  %s803_s6 = sshll.u32 %s933_s9, 4  ;;  %s804_s6 = int_to_ptr.vmem [resolvable:$false] %s803_s6 }
  0x54   : > { %s805_s11 = scalar_lea.vmem %s804_s6, 64  ;;  %p806_p11 = scmp.lt.s32.totalorder %s1097_s29, %s804_s6 }
  0x55   : > { %p801_p5 = pnand %p799_p4, %p785_p12  ;;  %p807_p13 = scmp.lt.s32.totalorder %s805_s11, %s798_s18 }
  0x57   : > { %p802_p10 = pneg %p801_p5  ;;  %p808_p2 = por %p807_p13, %p806_p11 }
  0x59   : > { %p809_p3 = pnand %p808_p2, %p802_p10 }
  0x5b   : > { %812 = shalt.err (!%p809_p3)
}
  0x5c   : > { %657 = dma.hbm_to_vmem [thread:$0]  (!%p1101_p7), %s1095_s10, 32, %s1097_s29, %s239_s13  }
  0x5d   : > { %p1239_p0 = scmp.ne.s32.totalorder %s1236_s27, 0 }
  0x5e   : > { %s262_s14 = sand.u32 (!%p1239_p0), 1, %s911_s19   ;;  %p1240_p12 = scmp.ne.s32.totalorder (!%p1239_p0), %s1235_s26, 0 }
  0x5f   : > { %260 = sbr.rel (%p1239_p0) target bundleno = 607 (0x25f), region = 36  ;;  %s583_s15 = sshll.u32 (!%p1239_p0), %s262_s14, 1 }
  0x60   : > { %s263_s17 = scalar_lea.sflag (!%p1239_p0), [#allocation3], %s262_s14  ;;  %s266_s28 = scalar_lea.vmem (!%p1239_p0), [#allocation2], %s583_s15 }
  0x66   : > { %890 = dma.done.wait (%p1240_p12), %s263_s17, 32  }
  0x67   : > { %892 = vsyncadd (%p1240_p12), %s263_s17, 4294967264  ;;  %p1241_p6 = scmp.ne.s32.totalorder %s1234_s25, 0 }
  0x69   : > { %894 = dma.done.wait (%p1241_p6), [#allocation6], 576  }
  0x6a   : > { %896 = vsyncadd (%p1241_p6), [#allocation6], 4294966720  ;;  %p297_p7 = scmp.eq.s32.totalorder %s919_s21, 0 }
  0x6b   : > { %vm303_vm0 = vcmask (%p297_p7), 261120   ;;  %v934_v0 = vmov (%p297_p7), 0.0  }
  0x6c   : > { %302 = sbr.rel (!%p297_p7) target bundleno = 115 (0x73), region = 52  ;;  %304 = vst.msk [vmem:[#allocation8] sm:$0xff] (%p297_p7), %vm303_vm0, %v934_v0 }
  0x73 PF: > { %v308_v1 = vld [vmem:[#allocation5] sm:$0xf]  ;;  %vm313_vm1 = vcmask 1043456   ;;  %v935_v2 = vmov 0.0   ;;  %vm936_vm2 = vmmov 0   ;;  %vm309_vm3 = vcmask 64512  }
  0x74   : > { %606 = vmatprep.subr.bf16.mxu0 %v935_v2  ;;  %v315_v3 = vsel %vm313_vm1, %v308_v1, 0  ;;  %608 = vmatprep.mubr.msk.bf16.mxu0 %vm936_vm2, %v935_v2  ;;  %v306_v4 = vld [vmem:[%s266_s28] sm:$0x3]  ;;  %p360_p9 = scmp.eq.s32.totalorder %s919_s21, 2  ;;  %v305_v6 = vld [vmem:[#allocation8] sm:$0xff]  ;;  %vm358_vm4 = vcmask 261120  }
  0x75   : > { %607 = vmatpush3.bf16.msra.mxu0 %v315_v3  ;;  %v307_v5 = vunpack.c.l.s8.bf16 %v306_v4  ;;  %v368_v12 = vld [vmem:[#allocation7] sm:$0xff] (%p360_p9)  ;;  %v369_v13 = vld [vmem:[#allocation7 + $0x8] sm:$0xff] (%p360_p9)  ;;  %v370_v14 = vld [vmem:[#allocation7 + $0x10] sm:$0xff] (%p360_p9)  ;;  %v937_v15 = vmov (%p360_p9), 0.0|0.0   ;;  %vm938_vm5 = vmmov (%p360_p9), 0   ;;  %v939_v18 = vmov (%p360_p9), 0.0  }
  0x76   : > { %623 = vmatprep.subr.bf16.mxu0 (%p360_p9), %v937_v15  ;;  %v624_v16 = vpack.c.bf16 (%p360_p9), %v369_v13, %v368_v12  ;;  %v371_v17 = vld [vmem:[#allocation7 + $0x18] sm:$0xff] (%p360_p9) }
  0x77   : > { %v627_v21 = vpack.c.bf16 (%p360_p9), %v371_v17, %v370_v14  ;;  %v589_v22 = vld [vmem:[%s1227_s3] ss:$0 sm:$0xff] (%p360_p9) }
  0x78   : > { %609 = vmatmul.mubr.msk.bf16.vlgmr.msra.gmra.mrb[0].mxu0 %vm309_vm3, %v307_v5 }
  0x79   : > { %620 = vmatprep.mubr.msk.f32.mxu0 (%p360_p9), %vm938_vm5, %v939_v18  ;;  %625 = vmatpush3.bf16.msra.mxu0 (%p360_p9), %v624_v16 }
  0x7a   : > { %626 = vmatprep.subr.bf16.mxu0 (%p360_p9), %v937_v15 }
  0x7d   : > { %628 = vmatpush3.bf16.msra.mxu0 (%p360_p9), %v627_v21 }
 0x148   : > { %364 = sbr.rel (!%p360_p9) target bundleno = 559 (0x22f), region = 56 }
 0x14b   : > { %v351_v7 = vpop.f32.mrb[0].mxu0 }
 0x14c   : > { %v357_v8 = vadd.f32 %v351_v7, %v305_v6  ;;  %v610_v9 = vpop.f32.mrb[1].mxu0 }
 0x14d   : > { %v354_v10 = vpop.f32.mrb[2].mxu0 }
 0x14e   : > { %359 = vst.msk [vmem:[#allocation8] sm:$0xff] %vm358_vm4, %v357_v8  ;;  %v611_v11 = vpop.f32.mrb[3].mxu0 }
 0x155   : > { %v365_v19 = vld [vmem:[#allocation8] sm:$0xff] }
 0x156   : > { %v366_v20 = vmul.f32 0.33333334, %v365_v19 }
 0x158   : > { %367 = vst.msk [vmem:[#allocation8] sm:$0xff] %vm358_vm4, %v366_v20  ;;  %621 = vmatmul.mubr.msk.f32.vlgmr.msra.gmra.mrb[0].mxu0 %vm358_vm4, %v366_v20 }
 0x22b   : > { %v448_v23 = vpop.f32.mrb[0].mxu0 }
 0x22c   : > { %v449_v24 = vadd.f32 %v589_v22, %v448_v23  ;;  %v622_v25 = vpop.f32.mrb[1].mxu0 }
 0x22e   : > { %452 = vst [vmem:[#allocation9] sm:$0xff] %v449_v24 }
 0x22f PF: > { %p1151_p8 = scmp.eq.s32.totalorder %s575_s24, 2  ;;  %s940_s27 = smov [#allocation8]  }
 0x230   : > { %s462_s10 = sshll.u32 %s940_s27, 4  ;;  %s941_s29 = smov [#allocation9]   ;;  %s463_s10 = int_to_ptr.vmem [resolvable:$true] %s462_s10 }
 0x231   : > { %s475_s12 = sshll.u32 %s941_s29, 4  ;;  %s813_s13 = scalar_lea.vmem %s463_s10, 128  ;;  %s1155_s12 = int_to_ptr.vmem [resolvable:$true] %s475_s12 }
 0x232   : > { %p814_p1 = scmp.ne.s32.totalorder %s463_s10, %s813_s13  ;;  %p820_p10 = scmp.lt.s32.totalorder %s463_s10, %s463_s10 }
 0x233   : > { %p821_p11 = scmp.lt.s32.totalorder %s813_s13, %s813_s13 }
 0x234   : > { %p815_p4 = pnand %p814_p1, %p1151_p8 }
 0x235   : > { %p822_p13 = por %p821_p11, %p820_p10 }
 0x236   : > { %p816_p5 = pneg %p815_p4 }
 0x238   : > { %p823_p2 = pnand %p822_p13, %p816_p5 }
 0x23a   : > { %826 = shalt.err (!%p823_p2)
}
 0x23b   : > { %s827_s7 = scalar_lea.hbm %s1228_s4, 128 }
 0x23c   : > { %p828_p3 = scmp.ne.s32.totalorder %s1228_s4, %s827_s7  ;;  %p833_p6 = scmp.lt.u32.totalorder %s827_s7, %s1228_s4 }
 0x23e   : > { %p829_p0 = pnand %p828_p3, %p1151_p8 }
 0x240   : > { %p830_p12 = pneg %p829_p0 }
 0x242   : > { %p835_p7 = pnand %p833_p6, %p830_p12 }
 0x244   : > { %838 = shalt.err (!%p835_p7)
}
 0x245   : > { %640 = dma.vmem_to_hbm [thread:$0]  (%p1151_p8), %s463_s10, 128, %s1228_s4, [#allocation4]  }
 0x246   : > { %s839_s17 = scalar_lea.vmem %s1155_s12, 128  ;;  %p846_p5 = scmp.lt.s32.totalorder %s1155_s12, %s1155_s12 }
 0x247   : > { %p840_p9 = scmp.ne.s32.totalorder %s1155_s12, %s839_s17  ;;  %p847_p10 = scmp.lt.s32.totalorder %s839_s17, %s839_s17 }
 0x249   : > { %p841_p1 = pnand %p840_p9, %p1151_p8  ;;  %p848_p11 = por %p847_p10, %p846_p5 }
 0x24b   : > { %p842_p4 = pneg %p841_p1 }
 0x24d   : > { %p849_p13 = pnand %p848_p11, %p842_p4 }
 0x24f   : > { %852 = shalt.err (!%p849_p13)
}
 0x250   : > { %s853_s25 = scalar_lea.hbm %s1229_s5, 128 }
 0x251   : > { %p854_p2 = scmp.ne.s32.totalorder %s1229_s5, %s853_s25  ;;  %p859_p12 = scmp.lt.u32.totalorder %s853_s25, %s1229_s5 }
 0x253   : > { %p855_p3 = pnand %p854_p2, %p1151_p8 }
 0x255   : > { %p856_p0 = pneg %p855_p3 }
 0x257   : > { %p861_p6 = pnand %p859_p12, %p856_p0 }
 0x259   : > { %864 = shalt.err (!%p861_p6)
}
 0x25a   : > { %642 = dma.vmem_to_hbm [thread:$0]  (%p1151_p8), %s1155_s12, 128, %s1229_s5, [#allocation10]  }
 0x25b   : > { %898 = dma.done.wait (%p1151_p8), [#allocation4], 128  }
 0x25c   : > { %900 = vsyncadd (%p1151_p8), [#allocation4], 4294967168 }
 0x25d   : > { %902 = dma.done.wait (%p1151_p8), [#allocation10], 128  }
 0x25e   : > { %904 = vsyncadd (%p1151_p8), [#allocation10], 4294967168 }
 0x25f PF: > { %s22_s23 = sadd.s32 1, %s927_s23   ;;  %s1243_s18 = smov %s911_s19 }
 0x260   : > { %p19_p7 = scmp.ge.s32.totalorder %s22_s23, 5   ;;  %s1244_s19 = smov %s915_s20 }
 0x261   : > { %s1245_s20 = smov %s1090_s8  ;;  %s1246_s21 = smov %s923_s22 }
 0x262   : > { %s1247_s22 = smov %s1249_s16  ;;  %21 = sbr.rel (!%p19_p7) target bundleno = 7 (0x7), region = 100 }
 0x269   :  { %492 = vsyncpa [#allocation3], 1 }
 0x26a   :  { %494 = vsyncpa [#allocation3 + $0x1], 1 }
 0x26b   :  { %495 = vsyncpa [#allocation6], 1 }
 0x26c   :  { %496 = vsyncpa [#allocation4], 1 }
 0x26d   :  { %498 = vsyncpa [#allocation4 + $0x1], 1 }
 0x26e   :  { %499 = vsyncpa [#allocation10], 1 }

// kernel: tpu_custom_call.1
= control target key start
LH: loop header
LB: loop body
LE: loop exit
PB: predicated region body
PF: predicated region fallthrough
CT: control target
= control target key end

     0   :  { %11 = vsyncpa [#allocation3], 0  ;;  %s1224_s0 = inlined_call_operand.hbm [shape: s8[3,8,8], index: 0, kind: input, shape index: {}]   ;;  %s1225_s1 = inlined_call_operand.hbm [shape: bf16[8,32], index: 1, kind: input, shape index: {}]   ;;  %s1226_s2 = inlined_call_operand.hbm [shape: f32[32,128], index: 2, kind: input, shape index: {}]   ;;  %s1227_s3 = inlined_call_operand.vmem [shape: f32[1,128], index: 3, kind: input, shape index: {}]   ;;  %s1228_s4 = inlined_call_operand.hbm [shape: f32[8,32], index: 4, kind: output, shape index: {0}]   ;;  %s1229_s5 = inlined_call_operand.hbm [shape: f32[8,128], index: 5, kind: output, shape index: {1}]  }
   0x1   :  { %13 = vsyncpa [#allocation3 + $0x1], 0 }
   0x2   :  { %14 = vsyncpa [#allocation6], 0 }
   0x3   :  { %15 = vsyncpa [#allocation4], 0 }
   0x4   :  { %16 = vsyncpa [#allocation10], 0  ;;  %s972_s18 = smov 0   ;;  %s974_s19 = smov 0  }
   0x5   :  { %s976_s20 = smov 0   ;;  %s978_s21 = smov 0  }
   0x6   :  { %s980_s22 = smov 0   ;;  %s982_s23 = smov 0  }
   0x7 LB: > { %s575_s24 = sadd.s32 4294967295, %s927_s23   ;;  %p65_p0 = scmp.ne.s32.totalorder %s911_s19, %s907_s18  ;;  %s927_s23 = sphi %s982_s23, %s22_s23   ;;  %s923_s22 = sphi %s980_s22, %s1247_s22   ;;  %s919_s21 = sphi %s978_s21, %s1246_s21   ;;  %s915_s20 = sphi %s976_s20, %s1245_s20   ;;  %s911_s19 = sphi %s974_s19, %s1244_s19   ;;  %s907_s18 = sphi %s972_s18, %s1243_s18  }
   0x8   : > { %p1004_p1 = scmp.eq.s32.totalorder %s575_s24, 0  ;;  %p576_p2 = scmp.ge.s32.totalorder %s927_s23, 1 }
   0x9   : > { %p196_p3 = scmp.lt.s32.totalorder %s927_s23, 4  ;;  %s929_s28 = smov [#allocation5]  }
   0xa   : > { %s1234_s25 = scalar_select %p1004_p1, 1, 0 }
   0xb   : > { %p1012_p4 = por %p1004_p1, %p65_p0  ;;  %p1016_p5 = pnand %p576_p2, %p196_p3 }
   0xc   : > { %s211_s29 = sshll.u32 %s929_s28, 4  ;;  %s930_s30 = smov [#allocation7]   ;;  %s212_s29 = int_to_ptr.vmem [resolvable:$true] %s211_s29 }
   0xd   : > { %s1235_s26 = scalar_select %p1012_p4, 1, 0 }
   0xe   : > { %s1236_s27 = scalar_select %p1016_p5, 1, 0 }
   0xf   : > { %p647_p6 = pneg %p1016_p5  ;;  %s221_s6 = sshll.u32 %s930_s30, 4  ;;  %s1028_s6 = int_to_ptr.vmem [resolvable:$true] %s221_s6 }
  0x10   : > { %s727_s10 = scalar_lea.hbm %s1225_s1, 64 }
  0x11   : > { %p1024_p7 = pnand %p647_p6, %p1004_p1  ;;  %p728_p8 = scmp.ne.s32.totalorder %s1225_s1, %s727_s10 }
  0x12   : > { %p734_p12 = scmp.lt.u32.totalorder %s727_s10, %s1225_s1 }
  0x13   : > { %p729_p9 = pneg %p1024_p7 }
  0x15   : > { %p730_p10 = pnand %p729_p9, %p728_p8 }
  0x17   : > { %p731_p11 = pneg %p730_p10 }
  0x19   : > { %p736_p13 = pnand %p734_p12, %p731_p11 }
  0x1b   : > { %739 = shalt.err (!%p736_p13)
}
  0x1c   : > { %s740_s15 = scalar_lea.vmem %s212_s29, 64  ;;  %p748_p6 = scmp.lt.s32.totalorder %s212_s29, %s212_s29 }
  0x1d   : > { %p741_p0 = scmp.ne.s32.totalorder %s212_s29, %s740_s15  ;;  %p749_p1 = scmp.lt.s32.totalorder %s740_s15, %s740_s15 }
  0x1f   : > { %p743_p2 = pnand %p741_p0, %p729_p9  ;;  %p750_p4 = por %p749_p1, %p748_p6 }
  0x21   : > { %p744_p3 = pneg %p743_p2 }
  0x23   : > { %p751_p5 = pnand %p750_p4, %p744_p3 }
  0x25   : > { %754 = shalt.err (!%p751_p5)
}
  0x26   : > { %650 = dma.hbm_to_vmem [thread:$0]  (!%p1024_p7), %s1225_s1, 64, %s212_s29, [#allocation6]  }
  0x27   : > { %s755_s30 = scalar_lea.hbm %s1226_s2, 512 }
  0x28   : > { %p756_p8 = scmp.ne.s32.totalorder %s1226_s2, %s755_s30  ;;  %p762_p5 = scmp.lt.u32.totalorder %s755_s30, %s1226_s2 }
  0x2a   : > { %p758_p1 = pnand %p756_p8, %p729_p9 }
  0x2c   : > { %p759_p4 = pneg %p758_p1 }
  0x2e   : > { %p764_p10 = pnand %p762_p5, %p759_p4 }
  0x30   : > { %767 = shalt.err (!%p764_p10)
}
  0x31   : > { %s768_s29 = scalar_lea.vmem %s1028_s6, 512  ;;  %p776_p0 = scmp.lt.s32.totalorder %s1028_s6, %s1028_s6 }
  0x32   : > { %p769_p11 = scmp.ne.s32.totalorder %s1028_s6, %s768_s29  ;;  %p777_p2 = scmp.lt.s32.totalorder %s768_s29, %s768_s29 }
  0x34   : > { %p771_p12 = pnand %p769_p11, %p729_p9  ;;  %p778_p3 = por %p777_p2, %p776_p0 }
  0x36   : > { %p772_p13 = pneg %p771_p12 }
  0x38   : > { %p779_p6 = pnand %p778_p3, %p772_p13 }
  0x3a   : > { %782 = shalt.err (!%p779_p6)
}
  0x3b   : > { %s931_s12 = smov 128   ;;  %s932_s13 = smov 8  }
  0x3c   : > { %653 = dma.hbm_to_vmem [thread:$0]  (!%p1024_p7), %s1226_s2, 512, %s1028_s6, [#allocation6], %s931_s12, %s931_s12, %s932_s13  }
  0x3d   : > { %s37_s16 = sadd.s32 1, %s923_s22  ;;  %s52_s17 = sadd.s32 1, %s915_s20 }
  0x3e   : > { %p39_p9 = scmp.ge.s32.totalorder %s37_s16, 3  ;;  %p59_p8 = scmp.ne.s32.totalorder %s915_s20, %s911_s19 }
  0x3f   : > { %p60_p1 = scmp.eq.s32.totalorder %s927_s23, 0  ;;  %p660_p4 = scmp.lt.s32.totalorder %s927_s23, 3 }
  0x40   : > { %s1249_s16 = smov (%p39_p9, %s37_s16), 0  ;;  %s238_s18 = sand.u32 1, %s915_s20  }
  0x41   : > { %p61_p5 = por %p60_p1, %p59_p8  ;;  %s45_s28 = ssub.s32 %s923_s22, %s1249_s16 }
  0x42   : > { %p50_p10 = scmp.eq.s32.totalorder %s45_s28, 0  ;;  %s580_s30 = sshll.u32 %s238_s18, 1 }
  0x43   : > { %s581_s7 = sshll.u32 %s923_s22, 5  ;;  %s242_s11 = scalar_lea.vmem [#allocation2], %s580_s30 }
  0x44   : > { %s1090_s8 = scalar_select %p50_p10, %s915_s20, %s52_s17  }
  0x45   : > { %s1095_s10 = scalar_lea.hbm %s1224_s0, %s581_s7  ;;  %s251_s29 = sshll.u32 %s242_s11, 4  ;;  %s1097_s29 = int_to_ptr.vmem [resolvable:$true] %s251_s29 }
  0x46   : > { %p1101_p7 = pnand %p660_p4, %p61_p5  ;;  %s239_s13 = scalar_lea.sflag [#allocation3], %s238_s18 }
  0x47   : > { %s783_s14 = scalar_lea.hbm %s1095_s10, 32  ;;  %s788_s28 = scalar_lea.hbm %s1224_s0, 96 }
  0x48   : > { %p784_p11 = scmp.ne.s32.totalorder %s1095_s10, %s783_s14  ;;  %p785_p12 = pneg %p1101_p7 }
  0x49   : > { %p789_p2 = scmp.lt.u32.totalorder %s1095_s10, %s1224_s0  ;;  %p790_p3 = scmp.lt.u32.totalorder %s788_s28, %s783_s14 }
  0x4a   : > { %p786_p13 = pnand %p785_p12, %p784_p11  ;;  %p792_p9 = scmp.lt.u32.totalorder %s783_s14, %s1095_s10 }
  0x4b   : > { %p791_p6 = por %p790_p3, %p789_p2 }
  0x4c   : > { %p787_p0 = pneg %p786_p13 }
  0x4d   : > { %p793_p8 = por %p792_p9, %p791_p6 }
  0x4f   : > { %p794_p1 = pnand %p793_p8, %p787_p0 }
  0x51   : > { %797 = shalt.err (!%p794_p1)
}
  0x52   : > { %s798_s18 = scalar_lea.vmem %s1097_s29, 32  ;;  %s933_s9 = smov [#allocation2]  }
  0x53   : > { %p799_p4 = scmp.ne.s32.totalorder %s1097_s29, %s798_s18  ;;  %s803_s6 = sshll.u32 %s933_s9, 4  ;;  %s804_s6 = int_to_ptr.vmem [resolvable:$false] %s803_s6 }
  0x54   : > { %s805_s11 = scalar_lea.vmem %s804_s6, 64  ;;  %p806_p11 = scmp.lt.s32.totalorder %s1097_s29, %s804_s6 }
  0x55   : > { %p801_p5 = pnand %p799_p4, %p785_p12  ;;  %p807_p13 = scmp.lt.s32.totalorder %s805_s11, %s798_s18 }
  0x57   : > { %p802_p10 = pneg %p801_p5  ;;  %p808_p2 = por %p807_p13, %p806_p11 }
  0x59   : > { %p809_p3 = pnand %p808_p2, %p802_p10 }
  0x5b   : > { %812 = shalt.err (!%p809_p3)
}
  0x5c   : > { %657 = dma.hbm_to_vmem [thread:$0]  (!%p1101_p7), %s1095_s10, 32, %s1097_s29, %s239_s13  }
  0x5d   : > { %p1239_p0 = scmp.ne.s32.totalorder %s1236_s27, 0 }
  0x5e   : > { %s262_s14 = sand.u32 (!%p1239_p0), 1, %s911_s19   ;;  %p1240_p12 = scmp.ne.s32.totalorder (!%p1239_p0), %s1235_s26, 0 }
  0x5f   : > { %260 = sbr.rel (%p1239_p0) target bundleno = 607 (0x25f), region = 36  ;;  %s583_s15 = sshll.u32 (!%p1239_p0), %s262_s14, 1 }
  0x60   : > { %s263_s17 = scalar_lea.sflag (!%p1239_p0), [#allocation3], %s262_s14  ;;  %s266_s28 = scalar_lea.vmem (!%p1239_p0), [#allocation2], %s583_s15 }
  0x66   : > { %890 = dma.done.wait (%p1240_p12), %s263_s17, 32  }
  0x67   : > { %892 = vsyncadd (%p1240_p12), %s263_s17, 4294967264  ;;  %p1241_p6 = scmp.ne.s32.totalorder %s1234_s25, 0 }
  0x69   : > { %894 = dma.done.wait (%p1241_p6), [#allocation6], 576  }
  0x6a   : > { %896 = vsyncadd (%p1241_p6), [#allocation6], 4294966720  ;;  %p297_p7 = scmp.eq.s32.totalorder %s919_s21, 0 }
  0x6b   : > { %vm303_vm0 = vcmask (%p297_p7), 261120   ;;  %v934_v0 = vmov (%p297_p7), 0.0  }
  0x6c   : > { %302 = sbr.rel (!%p297_p7) target bundleno = 115 (0x73), region = 52  ;;  %304 = vst.msk [vmem:[#allocation8] sm:$0xff] (%p297_p7), %vm303_vm0, %v934_v0 }
  0x73 PF: > { %v308_v1 = vld [vmem:[#allocation5] sm:$0xf]  ;;  %vm313_vm1 = vcmask 1043456   ;;  %v935_v2 = vmov 0.0   ;;  %vm936_vm2 = vmmov 0   ;;  %vm309_vm3 = vcmask 64512  }
  0x74   : > { %606 = vmatprep.subr.bf16.mxu0 %v935_v2  ;;  %v315_v3 = vsel %vm313_vm1, %v308_v1, 0  ;;  %608 = vmatprep.mubr.msk.bf16.mxu0 %vm936_vm2, %v935_v2  ;;  %v306_v4 = vld [vmem:[%s266_s28] sm:$0x3]  ;;  %p360_p9 = scmp.eq.s32.totalorder %s919_s21, 2  ;;  %v305_v6 = vld [vmem:[#allocation8] sm:$0xff]  ;;  %vm358_vm4 = vcmask 261120  }
  0x75   : > { %607 = vmatpush3.bf16.msra.mxu0 %v315_v3  ;;  %v307_v5 = vunpack.c.l.s8.bf16 %v306_v4  ;;  %v368_v12 = vld [vmem:[#allocation7] sm:$0xff] (%p360_p9)  ;;  %v369_v13 = vld [vmem:[#allocation7 + $0x8] sm:$0xff] (%p360_p9)  ;;  %v370_v14 = vld [vmem:[#allocation7 + $0x10] sm:$0xff] (%p360_p9)  ;;  %v937_v15 = vmov (%p360_p9), 0.0|0.0   ;;  %vm938_vm5 = vmmov (%p360_p9), 0   ;;  %v939_v18 = vmov (%p360_p9), 0.0  }
  0x76   : > { %623 = vmatprep.subr.bf16.mxu0 (%p360_p9), %v937_v15  ;;  %v624_v16 = vpack.c.bf16 (%p360_p9), %v369_v13, %v368_v12  ;;  %v371_v17 = vld [vmem:[#allocation7 + $0x18] sm:$0xff] (%p360_p9) }
  0x77   : > { %v627_v21 = vpack.c.bf16 (%p360_p9), %v371_v17, %v370_v14  ;;  %v589_v22 = vld [vmem:[%s1227_s3] ss:$0 sm:$0xff] (%p360_p9) }
  0x78   : > { %609 = vmatmul.mubr.msk.bf16.vlgmr.msra.gmra.mrb[0].mxu0 %vm309_vm3, %v307_v5 }
  0x79   : > { %620 = vmatprep.mubr.msk.f32.mxu0 (%p360_p9), %vm938_vm5, %v939_v18  ;;  %625 = vmatpush3.bf16.msra.mxu0 (%p360_p9), %v624_v16 }
  0x7a   : > { %626 = vmatprep.subr.bf16.mxu0 (%p360_p9), %v937_v15 }
  0x7d   : > { %628 = vmatpush3.bf16.msra.mxu0 (%p360_p9), %v627_v21 }
 0x148   : > { %364 = sbr.rel (!%p360_p9) target bundleno = 559 (0x22f), region = 56 }
 0x14b   : > { %v351_v7 = vpop.f32.mrb[0].mxu0 }
 0x14c   : > { %v357_v8 = vadd.f32 %v351_v7, %v305_v6  ;;  %v610_v9 = vpop.f32.mrb[1].mxu0 }
 0x14d   : > { %v354_v10 = vpop.f32.mrb[2].mxu0 }
 0x14e   : > { %359 = vst.msk [vmem:[#allocation8] sm:$0xff] %vm358_vm4, %v357_v8  ;;  %v611_v11 = vpop.f32.mrb[3].mxu0 }
 0x155   : > { %v365_v19 = vld [vmem:[#allocation8] sm:$0xff] }
 0x156   : > { %v366_v20 = vmul.f32 0.33333334, %v365_v19 }
 0x158   : > { %367 = vst.msk [vmem:[#allocation8] sm:$0xff] %vm358_vm4, %v366_v20  ;;  %621 = vmatmul.mubr.msk.f32.vlgmr.msra.gmra.mrb[0].mxu0 %vm358_vm4, %v366_v20 }
 0x22b   : > { %v448_v23 = vpop.f32.mrb[0].mxu0 }
 0x22c   : > { %v449_v24 = vadd.f32 %v589_v22, %v448_v23  ;;  %v622_v25 = vpop.f32.mrb[1].mxu0 }
 0x22e   : > { %452 = vst [vmem:[#allocation9] sm:$0xff] %v449_v24 }
 0x22f PF: > { %p1151_p8 = scmp.eq.s32.totalorder %s575_s24, 2  ;;  %s940_s27 = smov [#allocation8]  }
 0x230   : > { %s462_s10 = sshll.u32 %s940_s27, 4  ;;  %s941_s29 = smov [#allocation9]   ;;  %s463_s10 = int_to_ptr.vmem [resolvable:$true] %s462_s10 }
 0x231   : > { %s475_s12 = sshll.u32 %s941_s29, 4  ;;  %s813_s13 = scalar_lea.vmem %s463_s10, 128  ;;  %s1155_s12 = int_to_ptr.vmem [resolvable:$true] %s475_s12 }
 0x232   : > { %p814_p1 = scmp.ne.s32.totalorder %s463_s10, %s813_s13  ;;  %p820_p10 = scmp.lt.s32.totalorder %s463_s10, %s463_s10 }
 0x233   : > { %p821_p11 = scmp.lt.s32.totalorder %s813_s13, %s813_s13 }
 0x234   : > { %p815_p4 = pnand %p814_p1, %p1151_p8 }
 0x235   : > { %p822_p13 = por %p821_p11, %p820_p10 }
 0x236   : > { %p816_p5 = pneg %p815_p4 }
 0x238   : > { %p823_p2 = pnand %p822_p13, %p816_p5 }
 0x23a   : > { %826 = shalt.err (!%p823_p2)
}
 0x23b   : > { %s827_s7 = scalar_lea.hbm %s1228_s4, 128 }
 0x23c   : > { %p828_p3 = scmp.ne.s32.totalorder %s1228_s4, %s827_s7  ;;  %p833_p6 = scmp.lt.u32.totalorder %s827_s7, %s1228_s4 }
 0x23e   : > { %p829_p0 = pnand %p828_p3, %p1151_p8 }
 0x240   : > { %p830_p12 = pneg %p829_p0 }
 0x242   : > { %p835_p7 = pnand %p833_p6, %p830_p12 }
 0x244   : > { %838 = shalt.err (!%p835_p7)
}
 0x245   : > { %640 = dma.vmem_to_hbm [thread:$0]  (%p1151_p8), %s463_s10, 128, %s1228_s4, [#allocation4]  }
 0x246   : > { %s839_s17 = scalar_lea.vmem %s1155_s12, 128  ;;  %p846_p5 = scmp.lt.s32.totalorder %s1155_s12, %s1155_s12 }
 0x247   : > { %p840_p9 = scmp.ne.s32.totalorder %s1155_s12, %s839_s17  ;;  %p847_p10 = scmp.lt.s32.totalorder %s839_s17, %s839_s17 }
 0x249   : > { %p841_p1 = pnand %p840_p9, %p1151_p8  ;;  %p848_p11 = por %p847_p10, %p846_p5 }
 0x24b   : > { %p842_p4 = pneg %p841_p1 }
 0x24d   : > { %p849_p13 = pnand %p848_p11, %p842_p4 }
 0x24f   : > { %852 = shalt.err (!%p849_p13)
}
 0x250   : > { %s853_s25 = scalar_lea.hbm %s1229_s5, 128 }
 0x251   : > { %p854_p2 = scmp.ne.s32.totalorder %s1229_s5, %s853_s25  ;;  %p859_p12 = scmp.lt.u32.totalorder %s853_s25, %s1229_s5 }
 0x253   : > { %p855_p3 = pnand %p854_p2, %p1151_p8 }
 0x255   : > { %p856_p0 = pneg %p855_p3 }
 0x257   : > { %p861_p6 = pnand %p859_p12, %p856_p0 }
 0x259   : > { %864 = shalt.err (!%p861_p6)
}
 0x25a   : > { %642 = dma.vmem_to_hbm [thread:$0]  (%p1151_p8), %s1155_s12, 128, %s1229_s5, [#allocation10]  }
 0x25b   : > { %898 = dma.done.wait (%p1151_p8), [#allocation4], 128  }
 0x25c   : > { %900 = vsyncadd (%p1151_p8), [#allocation4], 4294967168 }
 0x25d   : > { %902 = dma.done.wait (%p1151_p8), [#allocation10], 128  }
 0x25e   : > { %904 = vsyncadd (%p1151_p8), [#allocation10], 4294967168 }
 0x25f PF: > { %s22_s23 = sadd.s32 1, %s927_s23   ;;  %s1243_s18 = smov %s911_s19 }
 0x260   : > { %p19_p7 = scmp.ge.s32.totalorder %s22_s23, 5   ;;  %s1244_s19 = smov %s915_s20 }
 0x261   : > { %s1245_s20 = smov %s1090_s8  ;;  %s1246_s21 = smov %s923_s22 }
 0x262   : > { %s1247_s22 = smov %s1249_s16  ;;  %21 = sbr.rel (!%p19_p7) target bundleno = 7 (0x7), region = 100 }
 0x269   :  { %492 = vsyncpa [#allocation3], 1 }
 0x26a   :  { %494 = vsyncpa [#allocation3 + $0x1], 1 }
 0x26b   :  { %495 = vsyncpa [#allocation6], 1 }
 0x26c   :  { %496 = vsyncpa [#allocation4], 1 }
 0x26d   :  { %498 = vsyncpa [#allocation4 + $0x1], 1 }
 0x26e   :  { %499 = vsyncpa [#allocation10], 1 }

</bundles_post_ra>
